<compile_context>
chip_gen: v7x
topology: tpu7x:2x2x1
jax: 0.10.0
libtpu: 0.0.40
codegen_flags: <defaults>
</compile_context>

<pallas_src>
import functools

import jax
import jax.numpy as jnp
from jax.experimental import pallas as pl
from jax.experimental.pallas import tpu as pltpu


def _round_up(x, m):
    return (x + m - 1) // m * m


def _conv_relu_kernel(x_ref, w_ref, b_ref, o_ref, *, Wp, KH, KW, Mw):
    # x_ref: (1, Cin_pad, Lp)      bf16 flattened zero-padded plane (lanes = flat spatial)
    # w_ref: (KH*KW, TCo, Cin_pad) bf16 per-tap weight slabs for this Cout tile
    # b_ref: (TCo, 1)              f32 bias
    # o_ref: (1, TCo, Mw)          Mw = Ho*Wp; wrap columns dropped by the wrapper
    x = x_ref[0]                     # (Cin_pad, Lp)
    bias = b_ref[...]                # (TCo, 1) f32, broadcasts over lanes

    acc = None
    for kh in range(KH):
        for kw in range(KW):
            t = kh * KW + kw
            off = kh * Wp + kw
            # One small MXU matmul per tap, accumulated in f32.
            part = jnp.dot(w_ref[t], x[:, off:off + Mw],
                           preferred_element_type=jnp.float32)   # (TCo, Mw)
            acc = part if acc is None else acc + part

    acc = jnp.maximum(acc + bias, 0.0)            # fused bias + ReLU epilogue
    o_ref[0] = acc.astype(o_ref.dtype)


def conv2d_relu(x_nchw, weight, bias, *, stride=1, padding=1,
                compute_dtype=jnp.bfloat16):
    """nn.Conv2d(stride=1) + ReLU. x_nchw: (N, Cin, H, W); weight: (Cout, Cin, KH, KW)."""
    assert stride == 1, "only stride=1 implemented for this GoogLeNet block"
    N, Cin, H, W = x_nchw.shape
    Cout, Cin_w, KH, KW = weight.shape
    assert Cin == Cin_w

    Hp, Wp = H + 2 * padding, W + 2 * padding
    Ho, Wo = Hp - KH + 1, Wp - KW + 1
    Mw = Ho * Wp                     # compute Wp-wide rows; wrap cols sliced off later

    # Sublane-friendly channel padding; Cout tiled for the grid.
    Cin_pad = _round_up(Cin, 8)
    Cout_pad = _round_up(Cout, 8)
    TCo = min(Cout_pad, 256)
    Cout_pad = _round_up(Cout_pad, TCo)
    n_co = Cout_pad // TCo

    # Tail rows so the last tap's flat slice (offset (KH-1)*Wp + KW-1) stays in bounds.
    extra_rows = -(-(KW - 1) // Wp)
    Lp = (Hp + extra_rows) * Wp

    # Cast first so the pad fuses onto the bf16 producer (half the pad traffic).
    x_bf = x_nchw.astype(compute_dtype)
    x_pad = jnp.pad(
        x_bf,
        ((0, 0), (0, Cin_pad - Cin),
         (padding, padding + extra_rows), (padding, padding)),
    )
    x_flat = x_pad.reshape(N, Cin_pad, Lp)

    # Per-tap weight slabs: w3[t, o, c] = weight[o, c, kh, kw], t = kh*KW + kw.
    w3 = jnp.transpose(weight, (2, 3, 0, 1)).reshape(KH * KW, Cout, Cin)
    w3 = jnp.pad(w3, ((0, 0), (0, Cout_pad - Cout), (0, Cin_pad - Cin)))
    w3 = w3.astype(compute_dtype)
    b2 = jnp.pad(bias.astype(jnp.float32), (0, Cout_pad - Cout)).reshape(Cout_pad, 1)

    kernel = functools.partial(_conv_relu_kernel, Wp=Wp, KH=KH, KW=KW, Mw=Mw)

    out_dtype = x_nchw.dtype
    itm = jnp.dtype(compute_dtype).itemsize
    x_blk = Cin_pad * Lp * itm
    w_blk = KH * KW * TCo * Cin_pad * itm
    b_blk = TCo * 4
    o_blk = TCo * Mw * jnp.dtype(out_dtype).itemsize
    acc_bytes = TCo * Mw * 4
    est = 2 * (x_blk + w_blk + b_blk + o_blk) + acc_bytes     # double-buffered blocks + acc
    vmem_limit = int(min(64 * 2**20, max(8 * 2**20, 2 * est)))

    in_bytes = (x_flat.size * itm + w3.size * itm + b2.size * 4)
    out_bytes = N * Cout_pad * Mw * jnp.dtype(out_dtype).itemsize

    out_flat = pl.pallas_call(
        kernel,
        out_shape=jax.ShapeDtypeStruct((N, Cout_pad, Mw), out_dtype),
        grid_spec=pltpu.PrefetchScalarGridSpec(
            num_scalar_prefetch=0,
            grid=(N, n_co),
            in_specs=[
                pl.BlockSpec((1, Cin_pad, Lp), lambda n, co: (n, 0, 0)),
                pl.BlockSpec((KH * KW, TCo, Cin_pad), lambda n, co: (0, co, 0)),
                pl.BlockSpec((TCo, 1), lambda n, co: (co, 0)),
            ],
            out_specs=pl.BlockSpec((1, TCo, Mw), lambda n, co: (n, co, 0)),
        ),
        compiler_params=pltpu.CompilerParams(
            dimension_semantics=("parallel", "parallel"),   # batch x Cout-tile: feeds both TCs
            vmem_limit_bytes=vmem_limit,
        ),
        cost_estimate=pl.CostEstimate(
            flops=2 * N * Cout_pad * (KH * KW * Cin_pad) * Mw,
            transcendentals=0,
            bytes_accessed=int(in_bytes + out_bytes),
        ),
    )(x_flat, w3, b2)

    # Drop padded Cout rows and the (Wp - Wo) wrap columns; reshape to NCHW.
    return out_flat.reshape(N, Cout_pad, Ho, Wp)[:, :Cout, :, :Wo]


if __name__ == "__main__":
    # Small shapes consistent with the module: conv2d(in_channel=4, out_channel=8,
    # kernel_size=3, padding=1) applied to x of shape (2, 4, 16, 16).
    key = jax.random.PRNGKey(0)
    k_x, k_w, k_b = jax.random.split(key, 3)

    N, Cin, H, W = 2, 4, 16, 16
    Cout, KH, KW = 8, 3, 3

    x = jax.random.normal(k_x, (N, Cin, H, W), dtype=jnp.float32)
    # Deterministic param init (kaiming-uniform-like bound, as in nn.Conv2d defaults).
    fan_in = Cin * KH * KW
    bound = 1.0 / (fan_in ** 0.5)
    weight = jax.random.uniform(
        k_w, (Cout, Cin, KH, KW), minval=-bound, maxval=bound, dtype=jnp.float32
    )
    bias = jax.random.uniform(
        k_b, (Cout,), minval=-bound, maxval=bound, dtype=jnp.float32
    )

    out = conv2d_relu(x, weight, bias, stride=1, padding=1)
    jax.block_until_ready(out)

    # Silent correctness check: XLA conv with the same bf16 operand rounding and
    # f32 accumulation, plus bias and ReLU.
    ref = jax.lax.conv_general_dilated(
        x.astype(jnp.bfloat16), weight.astype(jnp.bfloat16),
        window_strides=(1, 1), padding=((1, 1), (1, 1)),
        dimension_numbers=("NCHW", "OIHW", "NCHW"),
        preferred_element_type=jnp.float32,
    ) + bias.reshape(1, Cout, 1, 1)
    ref = jnp.maximum(ref, 0.0)
    assert out.shape == (N, Cout, H, W)
    assert jnp.allclose(out, ref, atol=5e-3, rtol=5e-3), float(jnp.max(jnp.abs(out - ref)))

    print("KERNEL_OK")
</pallas_src>

<mosaic_0001>
module attributes {stable_mosaic.version = 11 : i64} {
  func.func @_conv_relu_kernel(%arg0: i32, %arg1: i32, %arg2: memref<1x8x342xbf16, #tpu.memory_space<vmem>>, %arg3: memref<9x8x8xbf16, #tpu.memory_space<vmem>>, %arg4: memref<8x1xf32, #tpu.memory_space<vmem>>, %arg5: memref<1x8x288xf32, #tpu.memory_space<vmem>>) attributes {dimension_semantics = [#tpu.dimension_semantics<parallel>, #tpu.dimension_semantics<parallel>], iteration_bounds = array<i64: 2, 1>, scalar_prefetch = 0 : i64, scratch_operands = 0 : i64, tpu.core_type = #tpu.core_type<tc>, window_params = [{transform_indices = @transform_0, window_bounds = array<i64: 1, 8, 342>}, {transform_indices = @transform_1, window_bounds = array<i64: 9, 8, 8>}, {transform_indices = @transform_2, window_bounds = array<i64: 8, 1>}, {transform_indices = @transform_3, window_bounds = array<i64: 1, 8, 288>}]} {
    %c0 = arith.constant 0 : index
    %c0_0 = arith.constant 0 : index
    %c0_1 = arith.constant 0 : index
    %0 = vector.load %arg2[%c0, %c0_0, %c0_1] : memref<1x8x342xbf16, #tpu.memory_space<vmem>>, vector<1x8x342xbf16>
    %1 = vector.shape_cast %0 : vector<1x8x342xbf16> to vector<8x342xbf16>
    %c0_2 = arith.constant 0 : index
    %c0_3 = arith.constant 0 : index
    %2 = vector.load %arg4[%c0_2, %c0_3] : memref<8x1xf32, #tpu.memory_space<vmem>>, vector<8x1xf32>
    %c0_4 = arith.constant 0 : index
    %c0_5 = arith.constant 0 : index
    %c0_6 = arith.constant 0 : index
    %3 = vector.load %arg3[%c0_4, %c0_5, %c0_6] : memref<9x8x8xbf16, #tpu.memory_space<vmem>>, vector<1x8x8xbf16>
    %4 = vector.shape_cast %3 : vector<1x8x8xbf16> to vector<8x8xbf16>
    %5 = vector.extract_strided_slice %1 {offsets = [0, 0], sizes = [8, 288], strides = [1, 1]} : vector<8x342xbf16> to vector<8x288xbf16>
    %cst = arith.constant dense<0.000000e+00> : vector<8x288xf32>
    %6 = tpu.matmul %4, %5, %cst {dimension_numbers = #tpu.dot_dimension_numbers<[1], [0], [0], [1], [0, 0, 1, 1], [], []>} : vector<8x8xbf16>, vector<8x288xbf16>, vector<8x288xf32> -> vector<8x288xf32>
    %c1 = arith.constant 1 : index
    %c0_7 = arith.constant 0 : index
    %c0_8 = arith.constant 0 : index
    %7 = vector.load %arg3[%c1, %c0_7, %c0_8] : memref<9x8x8xbf16, #tpu.memory_space<vmem>>, vector<1x8x8xbf16>
    %8 = vector.shape_cast %7 : vector<1x8x8xbf16> to vector<8x8xbf16>
    %9 = vector.extract_strided_slice %1 {offsets = [0, 1], sizes = [8, 288], strides = [1, 1]} : vector<8x342xbf16> to vector<8x288xbf16>
    %cst_9 = arith.constant dense<0.000000e+00> : vector<8x288xf32>
    %10 = tpu.matmul %8, %9, %cst_9 {dimension_numbers = #tpu.dot_dimension_numbers<[1], [0], [0], [1], [0, 0, 1, 1], [], []>} : vector<8x8xbf16>, vector<8x288xbf16>, vector<8x288xf32> -> vector<8x288xf32>
    %11 = arith.addf %6, %10 : vector<8x288xf32>
    %c2 = arith.constant 2 : index
    %c0_10 = arith.constant 0 : index
    %c0_11 = arith.constant 0 : index
    %12 = vector.load %arg3[%c2, %c0_10, %c0_11] : memref<9x8x8xbf16, #tpu.memory_space<vmem>>, vector<1x8x8xbf16>
    %13 = vector.shape_cast %12 : vector<1x8x8xbf16> to vector<8x8xbf16>
    %14 = vector.extract_strided_slice %1 {offsets = [0, 2], sizes = [8, 288], strides = [1, 1]} : vector<8x342xbf16> to vector<8x288xbf16>
    %cst_12 = arith.constant dense<0.000000e+00> : vector<8x288xf32>
    %15 = tpu.matmul %13, %14, %cst_12 {dimension_numbers = #tpu.dot_dimension_numbers<[1], [0], [0], [1], [0, 0, 1, 1], [], []>} : vector<8x8xbf16>, vector<8x288xbf16>, vector<8x288xf32> -> vector<8x288xf32>
    %16 = arith.addf %11, %15 : vector<8x288xf32>
    %c3 = arith.constant 3 : index
    %c0_13 = arith.constant 0 : index
    %c0_14 = arith.constant 0 : index
    %17 = vector.load %arg3[%c3, %c0_13, %c0_14] : memref<9x8x8xbf16, #tpu.memory_space<vmem>>, vector<1x8x8xbf16>
    %18 = vector.shape_cast %17 : vector<1x8x8xbf16> to vector<8x8xbf16>
    %19 = vector.extract_strided_slice %1 {offsets = [0, 18], sizes = [8, 288], strides = [1, 1]} : vector<8x342xbf16> to vector<8x288xbf16>
    %cst_15 = arith.constant dense<0.000000e+00> : vector<8x288xf32>
    %20 = tpu.matmul %18, %19, %cst_15 {dimension_numbers = #tpu.dot_dimension_numbers<[1], [0], [0], [1], [0, 0, 1, 1], [], []>} : vector<8x8xbf16>, vector<8x288xbf16>, vector<8x288xf32> -> vector<8x288xf32>
    %21 = arith.addf %16, %20 : vector<8x288xf32>
    %c4 = arith.constant 4 : index
    %c0_16 = arith.constant 0 : index
    %c0_17 = arith.constant 0 : index
    %22 = vector.load %arg3[%c4, %c0_16, %c0_17] : memref<9x8x8xbf16, #tpu.memory_space<vmem>>, vector<1x8x8xbf16>
    %23 = vector.shape_cast %22 : vector<1x8x8xbf16> to vector<8x8xbf16>
    %24 = vector.extract_strided_slice %1 {offsets = [0, 19], sizes = [8, 288], strides = [1, 1]} : vector<8x342xbf16> to vector<8x288xbf16>
    %cst_18 = arith.constant dense<0.000000e+00> : vector<8x288xf32>
    %25 = tpu.matmul %23, %24, %cst_18 {dimension_numbers = #tpu.dot_dimension_numbers<[1], [0], [0], [1], [0, 0, 1, 1], [], []>} : vector<8x8xbf16>, vector<8x288xbf16>, vector<8x288xf32> -> vector<8x288xf32>
    %26 = arith.addf %21, %25 : vector<8x288xf32>
    %c5 = arith.constant 5 : index
    %c0_19 = arith.constant 0 : index
    %c0_20 = arith.constant 0 : index
    %27 = vector.load %arg3[%c5, %c0_19, %c0_20] : memref<9x8x8xbf16, #tpu.memory_space<vmem>>, vector<1x8x8xbf16>
    %28 = vector.shape_cast %27 : vector<1x8x8xbf16> to vector<8x8xbf16>
    %29 = vector.extract_strided_slice %1 {offsets = [0, 20], sizes = [8, 288], strides = [1, 1]} : vector<8x342xbf16> to vector<8x288xbf16>
    %cst_21 = arith.constant dense<0.000000e+00> : vector<8x288xf32>
    %30 = tpu.matmul %28, %29, %cst_21 {dimension_numbers = #tpu.dot_dimension_numbers<[1], [0], [0], [1], [0, 0, 1, 1], [], []>} : vector<8x8xbf16>, vector<8x288xbf16>, vector<8x288xf32> -> vector<8x288xf32>
    %31 = arith.addf %26, %30 : vector<8x288xf32>
    %c6 = arith.constant 6 : index
    %c0_22 = arith.constant 0 : index
    %c0_23 = arith.constant 0 : index
    %32 = vector.load %arg3[%c6, %c0_22, %c0_23] : memref<9x8x8xbf16, #tpu.memory_space<vmem>>, vector<1x8x8xbf16>
    %33 = vector.shape_cast %32 : vector<1x8x8xbf16> to vector<8x8xbf16>
    %34 = vector.extract_strided_slice %1 {offsets = [0, 36], sizes = [8, 288], strides = [1, 1]} : vector<8x342xbf16> to vector<8x288xbf16>
    %cst_24 = arith.constant dense<0.000000e+00> : vector<8x288xf32>
    %35 = tpu.matmul %33, %34, %cst_24 {dimension_numbers = #tpu.dot_dimension_numbers<[1], [0], [0], [1], [0, 0, 1, 1], [], []>} : vector<8x8xbf16>, vector<8x288xbf16>, vector<8x288xf32> -> vector<8x288xf32>
    %36 = arith.addf %31, %35 : vector<8x288xf32>
    %c7 = arith.constant 7 : index
    %c0_25 = arith.constant 0 : index
    %c0_26 = arith.constant 0 : index
    %37 = vector.load %arg3[%c7, %c0_25, %c0_26] : memref<9x8x8xbf16, #tpu.memory_space<vmem>>, vector<1x8x8xbf16>
    %38 = vector.shape_cast %37 : vector<1x8x8xbf16> to vector<8x8xbf16>
    %39 = vector.extract_strided_slice %1 {offsets = [0, 37], sizes = [8, 288], strides = [1, 1]} : vector<8x342xbf16> to vector<8x288xbf16>
    %cst_27 = arith.constant dense<0.000000e+00> : vector<8x288xf32>
    %40 = tpu.matmul %38, %39, %cst_27 {dimension_numbers = #tpu.dot_dimension_numbers<[1], [0], [0], [1], [0, 0, 1, 1], [], []>} : vector<8x8xbf16>, vector<8x288xbf16>, vector<8x288xf32> -> vector<8x288xf32>
    %41 = arith.addf %36, %40 : vector<8x288xf32>
    %c8 = arith.constant 8 : index
    %c0_28 = arith.constant 0 : index
    %c0_29 = arith.constant 0 : index
    %42 = vector.load %arg3[%c8, %c0_28, %c0_29] : memref<9x8x8xbf16, #tpu.memory_space<vmem>>, vector<1x8x8xbf16>
    %43 = vector.shape_cast %42 : vector<1x8x8xbf16> to vector<8x8xbf16>
    %44 = vector.extract_strided_slice %1 {offsets = [0, 38], sizes = [8, 288], strides = [1, 1]} : vector<8x342xbf16> to vector<8x288xbf16>
    %cst_30 = arith.constant dense<0.000000e+00> : vector<8x288xf32>
    %45 = tpu.matmul %43, %44, %cst_30 {dimension_numbers = #tpu.dot_dimension_numbers<[1], [0], [0], [1], [0, 0, 1, 1], [], []>} : vector<8x8xbf16>, vector<8x288xbf16>, vector<8x288xf32> -> vector<8x288xf32>
    %46 = arith.addf %41, %45 : vector<8x288xf32>
    %47 = vector.broadcast %2 : vector<8x1xf32> to vector<8x288xf32>
    %48 = arith.addf %46, %47 : vector<8x288xf32>
    %cst_31 = arith.constant 0.000000e+00 : f32
    %49 = vector.broadcast %cst_31 : f32 to vector<8x288xf32>
    %50 = arith.maximumf %48, %49 : vector<8x288xf32>
    %c0_32 = arith.constant 0 : index
    %c0_33 = arith.constant 0 : index
    %c0_34 = arith.constant 0 : index
    %51 = vector.load %arg5[%c0_32, %c0_33, %c0_34] : memref<1x8x288xf32, #tpu.memory_space<vmem>>, vector<1x8x288xf32>
    %52 = vector.shape_cast %51 : vector<1x8x288xf32> to vector<8x288xf32>
    %53 = vector.shape_cast %50 : vector<8x288xf32> to vector<1x8x288xf32>
    tpu.vector_store %arg5[%c0_32, %c0_33, %c0_34], %53 {strides = array<i32>} : memref<1x8x288xf32, #tpu.memory_space<vmem>>, vector<1x8x288xf32>,
    return
  }
  func.func @transform_0(%arg0: i32, %arg1: i32) -> (i32, i32, i32) {
    %c0_i32 = arith.constant 0 : i32
    %c0_i32_0 = arith.constant 0 : i32
    %c0_i32_1 = arith.constant 0 : i32
    return %arg0, %c0_i32, %c0_i32_0 : i32, i32, i32
  }
  func.func @transform_1(%arg0: i32, %arg1: i32) -> (i32, i32, i32) {
    %c0_i32 = arith.constant 0 : i32
    %c0_i32_0 = arith.constant 0 : i32
    %c0_i32_1 = arith.constant 0 : i32
    return %c0_i32, %arg1, %c0_i32_0 : i32, i32, i32
  }
  func.func @transform_2(%arg0: i32, %arg1: i32) -> (i32, i32) {
    %c0_i32 = arith.constant 0 : i32
    %c0_i32_0 = arith.constant 0 : i32
    return %arg1, %c0_i32 : i32, i32
  }
  func.func @transform_3(%arg0: i32, %arg1: i32) -> (i32, i32, i32) {
    %c0_i32 = arith.constant 0 : i32
    %c0_i32_0 = arith.constant 0 : i32
    return %arg0, %arg1, %c0_i32 : i32, i32, i32
  }
}

</mosaic_0001>

<bundles_post_ra>
// kernel: tpu_custom_call.1
= control target key start
LH: loop header
LB: loop body
LE: loop exit
PB: predicated region body
PF: predicated region fallthrough
CT: control target
= control target key end

     0   :  { %8 = vsyncpa [#allocation3], 0  ;;  %s1846_s0 = inlined_call_operand.vmem [shape: bf16[2,8,342], index: 0, kind: input, shape index: {}]   ;;  %s1847_s1 = inlined_call_operand.vmem [shape: bf16[9,8,8], index: 1, kind: input, shape index: {}]   ;;  %s1848_s2 = inlined_call_operand.vmem [shape: f32[8,1], index: 2, kind: input, shape index: {}]   ;;  %s1849_s3 = inlined_call_operand.hbm [shape: f32[2,8,288], index: 3, kind: output, shape index: {}]  }
   0x1   :  { %10 = vsyncpa [#allocation3 + $0x1], 0  ;;  %s1616_s12 = smov 0   ;;  %s1618_s13 = smov 0  }
   0x2   :  { %s1620_s14 = smov 0   ;;  %s1622_s15 = smov 0  }
   0x3   :  { %s1624_s16 = smov 0   ;;  %s1626_s17 = smov 0  }
   0x4 LB: > { %s1310_s18 = sadd.s32 4294967295, %s1582_s17   ;;  %s1311_s19 = sadd.s32 4294967294, %s1582_s17   ;;  %s1582_s17 = sphi %s1626_s17, %s16_s17   ;;  %s1578_s16 = sphi %s1624_s16, %s1856_s16   ;;  %s1574_s15 = sphi %s1622_s15, %s1855_s15   ;;  %s1570_s14 = sphi %s1620_s14, %s1854_s14   ;;  %s1566_s13 = sphi %s1618_s13, %s1853_s13   ;;  %s1562_s12 = sphi %s1616_s12, %s1852_s12  }
   0x5   : > { %s28_s20 = sadd.s32 1, %s1578_s16  ;;  %s115_s21 = sadd.s32 1, %s1570_s14 }
   0x6   : > { %p30_p0 = scmp.ge.s32.totalorder %s28_s20, 2  ;;  %p125_p1 = scmp.ne.s32.totalorder %s1570_s14, %s1566_s13 }
   0x7   : > { %p126_p2 = scmp.eq.s32.totalorder %s1310_s18, 1  ;;  %p131_p3 = scmp.ne.s32.totalorder %s1566_s13, %s1562_s12 }
   0x8   : > { %s1858_s20 = smov (%p30_p0, %s28_s20), 0  ;;  %p132_p5 = scmp.eq.s32.totalorder %s1311_s19, 1 }
   0x9   : > { %p1656_p4 = por %p126_p2, %p125_p1  ;;  %s110_s23 = ssub.s32 %s1578_s16, %s1858_s20 }
   0xa   : > { %p1316_p6 = scmp.ge.s32.totalorder %s1582_s17, 1  ;;  %p113_p7 = scmp.eq.s32.totalorder %s110_s23, 0 }
   0xb   : > { %p1663_p8 = por %p132_p5, %p131_p3  ;;  %p172_p9 = scmp.lt.s32.totalorder %s1582_s17, 3 }
   0xc   : > { %s1669_s25 = scalar_select %p113_p7, %s1570_s14, %s115_s21  }
   0xd   : > { %p173_p10 = pnand %p1316_p6, %p172_p9 }
   0xe   : > { %p204_p11 = scmp.lt.s32.totalorder (!%p173_p10), %s1574_s15, 1  ;;  %v1584_v0 = vmov (!%p173_p10), 0.0   ;;  %vm1585_vm0 = vmmov (!%p173_p10), 0   ;;  %v1586_v1 = vmov (!%p173_p10), 0   ;;  %s1587_s4 = smov (!%p173_p10), 127   ;;  %v220_v6 = vld [vmem:[%s1848_s2] sm:$0xff] (!%p173_p10) }
   0xf   : > { %176 = sbr.rel (%p173_p10) target bundleno = 451 (0x1c3), region = 32  ;;  %1377 = vmatprep.subr.bf16.mxu1 (!%p173_p10), %v1584_v0  ;;  %1379 = vmatprep.mubr.msk.bf16.mxu1 (!%p173_p10), %vm1585_vm0, %v1584_v0  ;;  %s1588_s5 = smov (!%p173_p10), 126   ;;  %vm245_vm1 = vcmask (!%p173_p10), 1043456   ;;  %v1318_v10 = vld [vmem:[%s1847_s1 + $0x4] sm:$0xf] (!%p173_p10)  ;;  %vm241_vm2 = vcmask (!%p173_p10), 64512  }
  0x10   : > { %287 = vmatprep.mubr.bf16.mxu0 (!%p173_p10), %v1586_v1  ;;  %1500 = vset.pattern.permute.xlu0 (!%p173_p10), %v1586_v1  ;;  %s1589_s6 = smov (!%p173_p10), 110   ;;  %s1590_s7 = smov (!%p173_p10), 109   ;;  %vm238_vm3 = vcmask (!%p173_p10), 1039360   ;;  %vm437_vm4 = vcmask (!%p173_p10), 1031168   ;;  %v221_v20 = vld [vmem:[%s1847_s1] sm:$0xf] (!%p173_p10) }
  0x11   : > { %s1591_s8 = smov (!%p173_p10), 108   ;;  %s1592_s9 = smov (!%p173_p10), 92   ;;  %vm544_vm5 = vcmask (!%p173_p10), 900096   ;;  %v1328_v29 = vld [vmem:[%s1847_s1 + $0x8] sm:$0xf] (!%p173_p10)  ;;  %vm651_vm6 = vcmask (!%p173_p10), 891904  }
  0x12   : > { %s1593_s10 = smov (!%p173_p10), 91   ;;  %s1594_s11 = smov (!%p173_p10), 90   ;;  %v1332_v37 = vld [vmem:[%s1847_s1 + $0xc] sm:$0xf] (!%p173_p10)  ;;  %vm758_vm7 = vcmask (!%p173_p10), 883712   ;;  %vm865_vm8 = vcmask (!%p173_p10), 752640  }
  0x13   : > { %v1336_v45 = vld [vmem:[%s1847_s1 + $0x10] sm:$0xf] (!%p173_p10)  ;;  %v1340_v53 = vld [vmem:[%s1847_s1 + $0x14] sm:$0xf] (!%p173_p10)  ;;  %vm972_vm9 = vcmask (!%p173_p10), 744448   ;;  %vm1079_vm10 = vcmask (!%p173_p10), 736256  }
  0x14   : > { %v1344_v61 = vld [vmem:[%s1847_s1 + $0x18] sm:$0xf] (!%p173_p10)  ;;  %s201_s23 = sand.u32 (!%p173_p10), 1, %s1566_s13   ;;  %vm1191_vm11 = vcmask (!%p173_p10), 261120   ;;  %s1433_s28 = smul.u32 (!%p173_p10), 384, %s1574_s15 }
  0x16   : > { %s205_s26 = scalar_select %p204_p11, %s1574_s15, 1 }
  0x17   : > { %s1194_s15 = scalar_lea.sflag [#allocation3], %s201_s23 }
  0x18   : > { %s1432_s27 = smul.u32 12, %s205_s26 }
  0x19   : > { %s1431_s26 = smul.u32 24, %s201_s23 }
  0x1a   : > { %s208_s30 = scalar_lea.vmem %s1846_s0, %s1432_s27 }
  0x1b   : > { %v1501_v2 = vld [vmem:[%s208_s30 + $0x8] ss:$0 sps:$4 sm:$0xff]   ;;  %v218_v3 = vld [vmem:[%s208_s30] sm:$0xff]  ;;  %s203_s27 = scalar_lea.vmem [#allocation2], %s1431_s26 }
  0x1c   : > { %v1319_v4 = vcombine.low %v218_v3, %v218_v3  ;;  %236 = vrot.lane.b32.xlu1 %v1501_v2, %s1587_s4  ;;  %v1320_v5 = vcombine.high %v218_v3, %v218_v3  ;;  %v346_v11 = vsel %vm245_vm1, %v1501_v2, 0  ;;  %s1210_s29 = sshll.u32 %s203_s27, 4  ;;  %s1799_s29 = int_to_ptr.vmem [resolvable:$true] %s1210_s29 }
  0x1e   : > { %232 = vrot.lane.b32.xlu0 %v1319_v4, %s1587_s4  ;;  %v340_v18 = vsel %vm245_vm1, %v1319_v4, 0 }
  0x20   : > { %431 = vrot.lane.b32.xlu1 %v1319_v4, %s1588_s5 }
  0x22   : > { %234 = vrot.lane.b32.xlu0 %v1320_v5, %s1587_s4 }
  0x24   : > { %435 = vrot.lane.b32.xlu1 %v1501_v2, %s1588_s5 }
  0x26   : > { %433 = vrot.lane.b32.xlu0 %v1320_v5, %s1588_s5  ;;  %s1797_s5 = scalar_lea.hbm %s1849_s3, %s1433_s28 }
  0x28   : > { %540 = vrot.lane.b32.xlu1 %v1320_v5, %s1589_s6 }
  0x2a   : > { %538 = vrot.lane.b32.xlu0 %v1319_v4, %s1589_s6 }
  0x2c   : > { %645 = vrot.lane.b32.xlu1 %v1319_v4, %s1590_s7 }
  0x2e   : > { %542 = vrot.lane.b32.xlu0 %v1501_v2, %s1589_s6  ;;  %s1504_s6 = scalar_lea.vmem %s1799_s29, 384 }
  0x2f   : > { %p1505_p12 = scmp.ne.s32.totalorder %s1799_s29, %s1504_s6 }
  0x30   : > { %649 = vrot.lane.b32.xlu1 %v1501_v2, %s1590_s7 }
  0x31   : > { %p1506_p13 = pnand %p1505_p12, %p1656_p4 }
  0x32   : > { %647 = vrot.lane.b32.xlu0 %v1320_v5, %s1590_s7  ;;  %s1595_s7 = smov [#allocation2]  }
  0x33   : > { %p1507_p0 = pneg %p1506_p13 }
  0x34   : > { %754 = vrot.lane.b32.xlu1 %v1320_v5, %s1591_s8 }
  0x36   : > { %752 = vrot.lane.b32.xlu0 %v1319_v4, %s1591_s8 }
  0x38   : > { %859 = vrot.lane.b32.xlu1 %v1319_v4, %s1592_s9 }
  0x3a   : > { %756 = vrot.lane.b32.xlu0 %v1501_v2, %s1591_s8  ;;  %s1508_s8 = sshll.u32 %s1595_s7, 4  ;;  %s1509_s8 = int_to_ptr.vmem [resolvable:$false] %s1508_s8 }
  0x3b   : > { %p1511_p1 = scmp.lt.s32.totalorder %s1799_s29, %s1509_s8 }
  0x3c   : > { %863 = vrot.lane.b32.xlu1 %v1501_v2, %s1592_s9 }
  0x3e   : > { %861 = vrot.lane.b32.xlu0 %v1320_v5, %s1592_s9  ;;  %s1510_s9 = scalar_lea.vmem %s1509_s8, 768 }
  0x3f   : > { %p1512_p2 = scmp.lt.s32.totalorder %s1510_s9, %s1504_s6 }
  0x40   : > { %968 = vrot.lane.b32.xlu1 %v1320_v5, %s1593_s10 }
  0x41   : > { %p1513_p3 = por %p1512_p2, %p1511_p1 }
  0x42   : > { %966 = vrot.lane.b32.xlu0 %v1319_v4, %s1593_s10 }
  0x43   : > { %p1514_p5 = pnand %p1513_p3, %p1507_p0 }
  0x44   : > { %1073 = vrot.lane.b32.xlu1 %v1319_v4, %s1594_s11 }
  0x46   : > { %970 = vrot.lane.b32.xlu0 %v1501_v2, %s1593_s10 }
  0x48   : > { %1077 = vrot.lane.b32.xlu1 %v1501_v2, %s1594_s11 }
  0x4a   : > { %1075 = vrot.lane.b32.xlu0 %v1320_v5, %s1594_s11 }
  0x4e   : > { %1180 = vperm.xlu0 %1500, %v220_v6   ;;  %v1348_v6 = vld [vmem:[%s1847_s1 + $0x1c] sm:$0xf] }
  0x8e   : > { %v237_v7 = vpop.permute.xlu1 %236 }
  0x8f   : > { %v253_v9 = vsel %vm245_vm1, %v237_v7, 0 }
  0x90   : > { %v233_v8 = vpop.permute.xlu0 %232  ;;  %1378 = vmatpush3.bf16.msra.mxu1 %v253_v9 }
  0x91   : > { %1383 = vmatprep.subr.bf16.mxu1 %v1584_v0 }
  0x92   : > { %v432_v12 = vpop.permute.xlu1 %431 }
  0x93   : > { %1380 = vmatmul.mubr.msk.bf16.vlgmr.msra.gmra.mrb[0].mxu1 %vm241_vm2, %v1318_v10 }
  0x94   : > { %v235_v13 = vpop.permute.xlu0 %234  ;;  %1384 = vmatpush3.bf16.msra.mxu1 %v346_v11  ;;  %1385 = vmatprep.mubr.msk.bf16.mxu1 %vm1585_vm0, %v1584_v0  ;;  %v1352_v11 = vld [vmem:[%s1847_s1 + $0x20] sm:$0xf] }
  0x95   : > { %v240_v14 = vsel %vm238_vm3, %v235_v13, %v237_v7  ;;  %v239_v15 = vsel %vm238_vm3, %v233_v8, %v235_v13  ;;  %1389 = vmatprep.subr.bf16.mxu1 %v1584_v0 }
  0x96   : > { %1322 = vmatprep.subr.msk.bf16.mxu0 %vm245_vm1, %v240_v14  ;;  %v247_v16 = vsel %vm245_vm1, %v239_v15, 0  ;;  %v436_v17 = vpop.permute.xlu1 %435 }
  0x97   : > { %256 = vmatpush1.bf16.msra.mxu0 %v247_v16  ;;  %v450_v22 = vsel %vm245_vm1, %v436_v17, 0 }
  0x98   : > { %1325 = vmatprep.subr.msk.bf16.mxu0 %vm245_vm1, %v1320_v5  ;;  %v434_v19 = vpop.permute.xlu0 %433 }
  0x99   : > { %v439_v21 = vsel %vm437_vm4, %v434_v19, %v436_v17  ;;  %v438_v25 = vsel %vm437_vm4, %v432_v12, %v434_v19 }
  0x9a   : > { %1323 = vmatmul.mubr.msk.bf16.vlgmr.msra.gmra.mrb[0].mxu0 %vm241_vm2, %v1318_v10  ;;  %v541_v23 = vpop.permute.xlu1 %540  ;;  %v444_v26 = vsel %vm245_vm1, %v438_v25, 0 }
  0x9b   : > { %349 = vmatpush1.bf16.msra.mxu0 %v340_v18  ;;  %380 = vmatprep.mubr.bf16.mxu0 %v1586_v1 }
  0x9c   : > { %1386 = vmatmul.mubr.msk.bf16.vlgmr.msra.gmra.mrb[4].mxu1 %vm241_vm2, %v221_v20  ;;  %1329 = vmatprep.subr.msk.bf16.mxu0 %vm245_vm1, %v439_v21  ;;  %v539_v24 = vpop.permute.xlu0 %538 }
  0x9d   : > { %1390 = vmatpush3.bf16.msra.mxu1 %v450_v22  ;;  %1391 = vmatprep.mubr.msk.bf16.mxu1 %vm1585_vm0, %v1584_v0  ;;  %v545_v33 = vsel %vm544_vm5, %v539_v24, %v541_v23 }
  0x9e   : > { %1395 = vmatprep.subr.bf16.mxu1 %v1584_v0  ;;  %v646_v28 = vpop.permute.xlu1 %645  ;;  %v551_v35 = vsel %vm245_vm1, %v545_v33, 0 }
  0xa0   : > { %v543_v27 = vpop.permute.xlu0 %542 }
  0xa1   : > { %v546_v30 = vsel %vm544_vm5, %v541_v23, %v543_v27  ;;  %v557_v31 = vsel %vm245_vm1, %v543_v27, 0 }
  0xa2   : > { %1326 = vmatmul.mubr.msk.bf16.vlgmr.msra.gmra.mrb[4].mxu0 %vm241_vm2, %v221_v20  ;;  %v650_v34 = vpop.permute.xlu1 %649 }
  0xa3   : > { %453 = vmatpush1.bf16.msra.mxu0 %v444_v26  ;;  %484 = vmatprep.mubr.bf16.mxu0 %v1586_v1  ;;  %v664_v39 = vsel %vm245_vm1, %v650_v34, 0 }
  0xa4   : > { %1392 = vmatmul.mubr.msk.bf16.vlgmr.msra.gmra.mrb[8].mxu1 %vm241_vm2, %v1328_v29  ;;  %1333 = vmatprep.subr.msk.bf16.mxu0 %vm245_vm1, %v546_v30  ;;  %v648_v32 = vpop.permute.xlu0 %647 }
  0xa5   : > { %1396 = vmatpush3.bf16.msra.mxu1 %v557_v31  ;;  %1397 = vmatprep.mubr.msk.bf16.mxu1 %vm1585_vm0, %v1584_v0  ;;  %v653_v38 = vsel %vm651_vm6, %v648_v32, %v650_v34  ;;  %v652_v41 = vsel %vm651_vm6, %v646_v28, %v648_v32 }
  0xa6   : > { %1401 = vmatprep.subr.bf16.mxu1 %v1584_v0  ;;  %v755_v40 = vpop.permute.xlu1 %754  ;;  %v658_v43 = vsel %vm245_vm1, %v652_v41, 0 }
  0xa8   : > { %v753_v36 = vpop.permute.xlu0 %752 }
  0xa9   : > { %v759_v49 = vsel %vm758_vm7, %v753_v36, %v755_v40 }
  0xaa   : > { %1330 = vmatmul.mubr.msk.bf16.vlgmr.msra.gmra.mrb[8].mxu0 %vm241_vm2, %v1328_v29  ;;  %v860_v44 = vpop.permute.xlu1 %859  ;;  %v765_v51 = vsel %vm245_vm1, %v759_v49, 0 }
  0xab   : > { %560 = vmatpush1.bf16.msra.mxu0 %v551_v35  ;;  %591 = vmatprep.mubr.bf16.mxu0 %v1586_v1 }
  0xac   : > { %1398 = vmatmul.mubr.msk.bf16.vlgmr.msra.gmra.mrb[12].mxu1 %vm241_vm2, %v1332_v37  ;;  %1337 = vmatprep.subr.msk.bf16.mxu0 %vm245_vm1, %v653_v38  ;;  %v757_v42 = vpop.permute.xlu0 %756 }
  0xad   : > { %1402 = vmatpush3.bf16.msra.mxu1 %v664_v39  ;;  %1403 = vmatprep.mubr.msk.bf16.mxu1 %vm1585_vm0, %v1584_v0  ;;  %v760_v46 = vsel %vm758_vm7, %v755_v40, %v757_v42  ;;  %v771_v47 = vsel %vm245_vm1, %v757_v42, 0 }
  0xae   : > { %1407 = vmatprep.subr.bf16.mxu1 %v1584_v0  ;;  %v864_v50 = vpop.permute.xlu1 %863 }
  0xaf   : > { %v878_v55 = vsel %vm245_vm1, %v864_v50, 0 }
  0xb0   : > { %v862_v48 = vpop.permute.xlu0 %861 }
  0xb1   : > { %v867_v54 = vsel %vm865_vm8, %v862_v48, %v864_v50  ;;  %v866_v57 = vsel %vm865_vm8, %v860_v44, %v862_v48 }
  0xb2   : > { %1334 = vmatmul.mubr.msk.bf16.vlgmr.msra.gmra.mrb[12].mxu0 %vm241_vm2, %v1332_v37  ;;  %v969_v56 = vpop.permute.xlu1 %968  ;;  %v872_v59 = vsel %vm245_vm1, %v866_v57, 0 }
  0xb3   : > { %667 = vmatpush1.bf16.msra.mxu0 %v658_v43  ;;  %698 = vmatprep.mubr.bf16.mxu0 %v1586_v1 }
  0xb4   : > { %1404 = vmatmul.mubr.msk.bf16.vlgmr.msra.gmra.mrb[16].mxu1 %vm241_vm2, %v1336_v45  ;;  %1341 = vmatprep.subr.msk.bf16.mxu0 %vm245_vm1, %v760_v46  ;;  %v967_v52 = vpop.permute.xlu0 %966 }
  0xb5   : > { %1408 = vmatpush3.bf16.msra.mxu1 %v771_v47  ;;  %1409 = vmatprep.mubr.msk.bf16.mxu1 %vm1585_vm0, %v1584_v0  ;;  %v973_v2 = vsel %vm972_vm9, %v967_v52, %v969_v56 }
  0xb6   : > { %1413 = vmatprep.subr.bf16.mxu1 %v1584_v0  ;;  %v1074_v60 = vpop.permute.xlu1 %1073  ;;  %v979_v5 = vsel %vm245_vm1, %v973_v2, 0 }
  0xb8   : > { %v971_v58 = vpop.permute.xlu0 %970 }
  0xb9   : > { %v974_v62 = vsel %vm972_vm9, %v969_v56, %v971_v58  ;;  %v985_v63 = vsel %vm245_vm1, %v971_v58, 0 }
  0xba   : > { %1338 = vmatmul.mubr.msk.bf16.vlgmr.msra.gmra.mrb[16].mxu0 %vm241_vm2, %v1336_v45  ;;  %v1078_v4 = vpop.permute.xlu1 %1077 }
  0xbb   : > { %774 = vmatpush1.bf16.msra.mxu0 %v765_v51  ;;  %805 = vmatprep.mubr.bf16.mxu0 %v1586_v1  ;;  %v1092_v8 = vsel %vm245_vm1, %v1078_v4, 0 }
  0xbc   : > { %1410 = vmatmul.mubr.msk.bf16.vlgmr.msra.gmra.mrb[20].mxu1 %vm241_vm2, %v1340_v53  ;;  %1345 = vmatprep.subr.msk.bf16.mxu0 %vm245_vm1, %v867_v54  ;;  %v1076_v3 = vpop.permute.xlu0 %1075 }
  0xbd   : > { %1414 = vmatpush3.bf16.msra.mxu1 %v878_v55  ;;  %1415 = vmatprep.mubr.msk.bf16.mxu1 %vm1585_vm0, %v1584_v0  ;;  %v1081_v7 = vsel %vm1079_vm10, %v1076_v3, %v1078_v4  ;;  %v1080_v9 = vsel %vm1079_vm10, %v1074_v60, %v1076_v3 }
  0xbe   : > { %1419 = vmatprep.subr.bf16.mxu1 %v1584_v0  ;;  %v1086_v10 = vsel %vm245_vm1, %v1080_v9, 0 }
  0xc2   : > { %1342 = vmatmul.mubr.msk.bf16.vlgmr.msra.gmra.mrb[20].mxu0 %vm241_vm2, %v1340_v53 }
  0xc3   : > { %881 = vmatpush1.bf16.msra.mxu0 %v872_v59  ;;  %912 = vmatprep.mubr.bf16.mxu0 %v1586_v1 }
  0xc4   : > { %1416 = vmatmul.mubr.msk.bf16.vlgmr.msra.gmra.mrb[24].mxu1 %vm241_vm2, %v1344_v61  ;;  %1349 = vmatprep.subr.msk.bf16.mxu0 %vm245_vm1, %v974_v62 }
  0xc5   : > { %1420 = vmatpush3.bf16.msra.mxu1 %v985_v63  ;;  %1421 = vmatprep.mubr.msk.bf16.mxu1 %vm1585_vm0, %v1584_v0 }
  0xc6   : > { %1425 = vmatprep.subr.bf16.mxu1 %v1584_v0 }
  0xca   : > { %1346 = vmatmul.mubr.msk.bf16.vlgmr.msra.gmra.mrb[24].mxu0 %vm241_vm2, %v1344_v61 }
  0xcb   : > { %988 = vmatpush1.bf16.msra.mxu0 %v979_v5  ;;  %1019 = vmatprep.mubr.bf16.mxu0 %v1586_v1 }
  0xcc   : > { %1422 = vmatmul.mubr.msk.bf16.vlgmr.msra.gmra.mrb[28].mxu1 %vm241_vm2, %v1348_v6  ;;  %1353 = vmatprep.subr.msk.bf16.mxu0 %vm245_vm1, %v1081_v7 }
  0xcd   : > { %1426 = vmatpush3.bf16.msra.mxu1 %v1092_v8  ;;  %1427 = vmatprep.mubr.msk.bf16.mxu1 %vm1585_vm0, %v1584_v0 }
  0xd2   : > { %1350 = vmatmul.mubr.msk.bf16.vlgmr.msra.gmra.mrb[28].mxu0 %vm241_vm2, %v1348_v6 }
  0xd3   : > { %1095 = vmatpush1.bf16.msra.mxu0 %v1086_v10  ;;  %1126 = vmatprep.mubr.bf16.mxu0 %v1586_v1 }
  0xd4   : > { %1428 = vmatmul.mubr.msk.bf16.vlgmr.msra.gmra.mrb[32].mxu1 %vm241_vm2, %v1352_v11 }
  0xda   : > { %1354 = vmatmul.mubr.msk.bf16.vlgmr.msra.gmra.mrb[32].mxu0 %vm241_vm2, %v1352_v11 }
 0x166   : > { %v330_v12 = vpop.f32.mrb[0].mxu1 }
 0x167   : > { %v1381_v13 = vpop.f32.mrb[1].mxu1 }
 0x168   : > { %v333_v14 = vpop.f32.mrb[2].mxu1 }
 0x169   : > { %v1382_v15 = vpop.f32.mrb[3].mxu1 }
 0x16d   : > { %v289_v0 = vpop.f32.mrb[0].mxu0 }
 0x16e   : > { %v291_v16 = vpop.f32.mrb[1].mxu0 }
 0x16f   : > { %v293_v17 = vpop.f32.mrb[2].mxu0  ;;  %v423_v18 = vpop.f32.mrb[4].mxu1 }
 0x170   : > { %v294_v19 = vpop.f32.mrb[3].mxu0  ;;  %v424_v20 = vadd.f32 %v423_v18, %v330_v12  ;;  %v1387_v21 = vpop.f32.mrb[5].mxu1 }
 0x171   : > { %v426_v22 = vpop.f32.mrb[6].mxu1 }
 0x172   : > { %v1388_v23 = vpop.f32.mrb[7].mxu1 }
 0x175   : > { %v382_v24 = vpop.f32.mrb[4].mxu0 }
 0x176   : > { %v383_v25 = vadd.f32 %v382_v24, %v289_v0  ;;  %v384_v1 = vpop.f32.mrb[5].mxu0 }
 0x177   : > { %v385_v26 = vadd.f32 %v384_v1, %v291_v16  ;;  %v386_v27 = vpop.f32.mrb[6].mxu0  ;;  %v527_v28 = vpop.f32.mrb[8].mxu1 }
 0x178   : > { %v387_v29 = vpop.f32.mrb[7].mxu0  ;;  %v535_v30 = vadd.f32 %v527_v28, %v424_v20  ;;  %v1393_v31 = vpop.f32.mrb[9].mxu1 }
 0x179   : > { %v530_v32 = vpop.f32.mrb[10].mxu1  ;;  %v1181_v28 = vpop.permute.xlu0 %1180 }
 0x17a   : > { %v1394_v33 = vpop.f32.mrb[11].mxu1 }
 0x17d   : > { %v486_v34 = vpop.f32.mrb[8].mxu0 }
 0x17e   : > { %v533_v35 = vadd.f32 %v486_v34, %v383_v25  ;;  %v488_v36 = vpop.f32.mrb[9].mxu0 }
 0x17f   : > { %v534_v37 = vadd.f32 %v488_v36, %v385_v26  ;;  %v490_v38 = vpop.f32.mrb[10].mxu0  ;;  %v634_v39 = vpop.f32.mrb[12].mxu1 }
 0x180   : > { %v491_v40 = vpop.f32.mrb[11].mxu0  ;;  %v642_v41 = vadd.f32 %v634_v39, %v535_v30  ;;  %v1399_v42 = vpop.f32.mrb[13].mxu1 }
 0x181   : > { %v637_v43 = vpop.f32.mrb[14].mxu1 }
 0x182   : > { %v1400_v44 = vpop.f32.mrb[15].mxu1 }
 0x185   : > { %v593_v45 = vpop.f32.mrb[12].mxu0 }
 0x186   : > { %v640_v46 = vadd.f32 %v593_v45, %v533_v35  ;;  %v595_v47 = vpop.f32.mrb[13].mxu0 }
 0x187   : > { %v641_v48 = vadd.f32 %v595_v47, %v534_v37  ;;  %v597_v49 = vpop.f32.mrb[14].mxu0  ;;  %v741_v50 = vpop.f32.mrb[16].mxu1 }
 0x188   : > { %v598_v51 = vpop.f32.mrb[15].mxu0  ;;  %v749_v52 = vadd.f32 %v741_v50, %v642_v41  ;;  %v1405_v53 = vpop.f32.mrb[17].mxu1 }
 0x189   : > { %v744_v54 = vpop.f32.mrb[18].mxu1 }
 0x18a   : > { %v1406_v55 = vpop.f32.mrb[19].mxu1 }
 0x18d   : > { %v700_v56 = vpop.f32.mrb[16].mxu0 }
 0x18e   : > { %v747_v57 = vadd.f32 %v700_v56, %v640_v46  ;;  %v702_v58 = vpop.f32.mrb[17].mxu0 }
 0x18f   : > { %v748_v59 = vadd.f32 %v702_v58, %v641_v48  ;;  %v704_v60 = vpop.f32.mrb[18].mxu0  ;;  %v848_v61 = vpop.f32.mrb[20].mxu1 }
 0x190   : > { %v705_v62 = vpop.f32.mrb[19].mxu0  ;;  %v856_v63 = vadd.f32 %v848_v61, %v749_v52  ;;  %v1411_v2 = vpop.f32.mrb[21].mxu1 }
 0x191   : > { %v851_v3 = vpop.f32.mrb[22].mxu1 }
 0x192   : > { %v1412_v4 = vpop.f32.mrb[23].mxu1 }
 0x195   : > { %v807_v5 = vpop.f32.mrb[20].mxu0 }
 0x196   : > { %v854_v6 = vadd.f32 %v807_v5, %v747_v57  ;;  %v809_v7 = vpop.f32.mrb[21].mxu0 }
 0x197   : > { %v855_v8 = vadd.f32 %v809_v7, %v748_v59  ;;  %v811_v9 = vpop.f32.mrb[22].mxu0  ;;  %v955_v10 = vpop.f32.mrb[24].mxu1 }
 0x198   : > { %v812_v11 = vpop.f32.mrb[23].mxu0  ;;  %v963_v12 = vadd.f32 %v955_v10, %v856_v63  ;;  %v1417_v13 = vpop.f32.mrb[25].mxu1 }
 0x199   : > { %v958_v14 = vpop.f32.mrb[26].mxu1 }
 0x19a   : > { %v1418_v15 = vpop.f32.mrb[27].mxu1 }
 0x19d   : > { %v914_v0 = vpop.f32.mrb[24].mxu0 }
 0x19e   : > { %v961_v16 = vadd.f32 %v914_v0, %v854_v6  ;;  %v916_v17 = vpop.f32.mrb[25].mxu0 }
 0x19f   : > { %v962_v18 = vadd.f32 %v916_v17, %v855_v8  ;;  %v918_v19 = vpop.f32.mrb[26].mxu0  ;;  %v1062_v20 = vpop.f32.mrb[28].mxu1 }
 0x1a0   : > { %v919_v21 = vpop.f32.mrb[27].mxu0  ;;  %v1070_v22 = vadd.f32 %v1062_v20, %v963_v12  ;;  %v1423_v23 = vpop.f32.mrb[29].mxu1 }
 0x1a1   : > { %v1065_v24 = vpop.f32.mrb[30].mxu1 }
 0x1a2   : > { %v1424_v25 = vpop.f32.mrb[31].mxu1 }
 0x1a5   : > { %v1021_v1 = vpop.f32.mrb[28].mxu0 }
 0x1a6   : > { %v1068_v26 = vadd.f32 %v1021_v1, %v961_v16  ;;  %v1023_v27 = vpop.f32.mrb[29].mxu0 }
 0x1a7   : > { %v1069_v29 = vadd.f32 %v1023_v27, %v962_v18  ;;  %v1025_v30 = vpop.f32.mrb[30].mxu0  ;;  %v1169_v31 = vpop.f32.mrb[32].mxu1 }
 0x1a8   : > { %v1026_v32 = vpop.f32.mrb[31].mxu0  ;;  %v1177_v33 = vadd.f32 %v1169_v31, %v1070_v22  ;;  %v1429_v34 = vpop.f32.mrb[33].mxu1 }
 0x1a9   : > { %v1172_v35 = vpop.f32.mrb[34].mxu1 }
 0x1aa   : > { %v1185_v36 = vadd.f32 %v1181_v28, %v1177_v33  ;;  %v1430_v37 = vpop.f32.mrb[35].mxu1 }
 0x1ac   : > { %v1188_v38 = vmax.f32 %v1185_v36, 0.0 }
 0x1ad   : > { %v1128_v39 = vpop.f32.mrb[32].mxu0 }
 0x1ae   : > { %1192 = vst.msk [vmem:[%s203_s27 + $0x10] sm:$0xff] %vm1191_vm11, %v1188_v38  ;;  %v1175_v40 = vadd.f32 %v1128_v39, %v1068_v26  ;;  %v1130_v41 = vpop.f32.mrb[33].mxu0 }
 0x1af   : > { %v1176_v42 = vadd.f32 %v1130_v41, %v1069_v29  ;;  %v1132_v43 = vpop.f32.mrb[34].mxu0 }
 0x1b0   : > { %v1183_v44 = vadd.f32 %v1181_v28, %v1175_v40  ;;  %v1133_v45 = vpop.f32.mrb[35].mxu0 }
 0x1b1   : > { %v1184_v46 = vadd.f32 %v1181_v28, %v1176_v42 }
 0x1b2   : > { %v1186_v47 = vmax.f32 %v1183_v44, 0.0 }
 0x1b3   : > { %v1187_v48 = vmax.f32 %v1184_v46, 0.0 }
 0x1b4   : > { %1189 = vst [vmem:[%s203_s27] sm:$0xff] %v1186_v47 }
 0x1b5   : > { %1190 = vst [vmem:[%s203_s27 + $0x8] sm:$0xff] %v1187_v48 }
 0x1b6   : > { %1517 = shalt.err (!%p1514_p5)
}
 0x1b7   : > { %s1518_s10 = scalar_lea.hbm %s1797_s5, 384  ;;  %s1522_s19 = scalar_lea.hbm %s1849_s3, 768 }
 0x1b8   : > { %p1519_p6 = scmp.ne.s32.totalorder %s1797_s5, %s1518_s10  ;;  %p1523_p10 = scmp.lt.u32.totalorder %s1797_s5, %s1849_s3 }
 0x1b9   : > { %p1524_p11 = scmp.lt.u32.totalorder %s1522_s19, %s1518_s10  ;;  %p1526_p13 = scmp.lt.u32.totalorder %s1518_s10, %s1797_s5 }
 0x1ba   : > { %p1520_p7 = pnand %p1519_p6, %p1656_p4 }
 0x1bb   : > { %p1525_p12 = por %p1524_p11, %p1523_p10 }
 0x1bc   : > { %p1521_p9 = pneg %p1520_p7 }
 0x1bd   : > { %p1527_p0 = por %p1526_p13, %p1525_p12 }
 0x1bf   : > { %p1528_p1 = pnand %p1527_p0, %p1521_p9 }
 0x1c1   : > { %1531 = shalt.err (!%p1528_p1)
}
 0x1c2   : > { %1434 = dma.vmem_to_hbm [thread:$0]  (%p1656_p4), %s1799_s29, 384, %s1797_s5, %s1194_s15  }
 0x1c3 PF: > { %p1440_p2 = scmp.ge.s32.totalorder %s1582_s17, 2  ;;  %s1222_s26 = sand.u32 1, %s1562_s12  }
 0x1c4   : > { %s1223_s27 = scalar_lea.sflag [#allocation3], %s1222_s26 }
 0x1c5   : > { %p1437_p3 = pnand %p1440_p2, %p1663_p8 }
 0x1c7   : > { %1557 = dma.done.wait (!%p1437_p3), %s1223_s27, 384  }
 0x1c8   : > { %1559 = vsyncadd (!%p1437_p3), %s1223_s27, 4294966912  ;;  %s16_s17 = sadd.s32 1, %s1582_s17   ;;  %s1852_s12 = smov %s1566_s13 }
 0x1c9   : > { %p13_p5 = scmp.ge.s32.totalorder %s16_s17, 4   ;;  %s1853_s13 = smov %s1570_s14 }
 0x1ca   : > { %s1854_s14 = smov %s1669_s25  ;;  %s1855_s15 = smov %s1578_s16 }
 0x1cb   : > { %s1856_s16 = smov %s1858_s20  ;;  %15 = sbr.rel (!%p13_p5) target bundleno = 4 (0x4), region = 81 }
 0x1d2   :  { %1228 = vsyncpa [#allocation3], 1 }
 0x1d3   :  { %1230 = vsyncpa [#allocation3 + $0x1], 1 }

</bundles_post_ra>
